<compile_context>
chip_gen: v6e
topology: v6e:2x2x1
jax: 0.10.0
libtpu: 0.0.40
codegen_flags: <defaults>
</compile_context>

<pallas_src>
import functools

import numpy as np
import jax
import jax.numpy as jnp
from jax import lax
from jax.experimental import pallas as pl
from jax.experimental.pallas import tpu as pltpu


def _activation(x, act):
    # getattr(nn, act)() equivalent for the common cases (applied in f32).
    if act == "ReLU":
        return jnp.maximum(x, 0.0)
    if act == "ELU":
        # clamp the discarded branch so expm1 never sees large positives (-> inf)
        return jnp.where(x > 0, x, jnp.expm1(jnp.minimum(x, 0.0)))
    if act == "Hardtanh":
        return jnp.clip(x, -1.0, 1.0)
    if act == "Sigmoid":
        return jax.nn.sigmoid(x)
    if act == "Tanh":
        return jnp.tanh(x)
    # TODO(synk): other torch.nn activations can be added here as needed.
    raise ValueError(f"unsupported activation: {act}")


def _mlp_kernel(x_ref, *refs, num_hidden, act, sub_m, compute_dtype):
    """refs = (w_pre, b_pre, [w_h, b_h] * num_hidden, w_out, b_out, o_ref)."""
    o_ref = refs[-1]
    params = refs[:-1]
    tile_m = x_ref.shape[0]
    n_sub = tile_m // sub_m

    def sub_block(s, carry):
        r0 = pl.multiple_of(s * sub_m, sub_m)
        # f32 rows come straight from HBM; cast to the MXU operand dtype on the VPU.
        x = x_ref[pl.ds(r0, sub_m), :].astype(compute_dtype)

        # pre_mlp_linear (no activation afterwards, matches the PyTorch forward)
        w, b = params[0], params[1]
        acc = jnp.dot(x, w[...], preferred_element_type=jnp.float32) + b[...]

        # hidden layers: Linear -> activation (bias/activation in f32 on the accumulator)
        for i in range(num_hidden):
            w, b = params[2 + 2 * i], params[3 + 2 * i]
            acc = jnp.dot(acc.astype(compute_dtype), w[...],
                          preferred_element_type=jnp.float32) + b[...]
            acc = _activation(acc, act)

        # output_layer (no activation)
        w, b = params[-2], params[-1]
        acc = jnp.dot(acc.astype(compute_dtype), w[...],
                      preferred_element_type=jnp.float32) + b[...]

        o_ref[pl.ds(r0, sub_m), :] = acc.astype(o_ref.dtype)
        return carry

    # Unrolled so the LLO scheduler can overlap MXU / VPU / loads-stores across
    # sub-blocks (a visible non-unrolled short loop measured ~-35%).
    lax.fori_loop(0, n_sub, sub_block, 0, unroll=True)


def _num_tensorcores_per_chip():
    """2 on v7x (2 TCs/chip), 1 on v5e/v6e.  Falls back to 1 if detection fails."""
    try:
        kind = jax.devices()[0].device_kind.lower()
        return 2 if "v7" in kind else 1
    except Exception:  # pragma: no cover - defensive
        return 1


def _round_up(x, m):
    return -(-x // m) * m


def autoencoder_forward(expression, params, *, act="ReLU", tile_m=1024, sub_m=128,
                        compute_dtype=jnp.bfloat16, out_dtype=None):
    """expression: (batch, num_neighbors, features). params: list of (W, b) with
    W already transposed to (in_features, out_features)."""
    batch, nnb, feat = expression.shape
    # Input stays in its original dtype (f32): the kernel casts on the VPU, which is
    # hidden under DMA/MXU; a wrapper-side astype would be an extra HBM pass.
    x2d = expression.reshape(batch * nnb, feat)
    M = x2d.shape[0]

    out_dim = params[-1][0].shape[1]
    num_hidden = len(params) - 2
    out_dtype = expression.dtype if out_dtype is None else out_dtype

    # Row alignment: bf16 packs 16 sublanes per vreg.
    row_align = 16 if np.dtype(compute_dtype) == np.dtype(jnp.bfloat16) else 8

    tile_m = int(tile_m)
    if M <= tile_m:
        if _num_tensorcores_per_chip() >= 2 and M > row_align:
            # v7x: split a single-tile problem into 2 tiles so both TensorCores work.
            tile_m = max(row_align, _round_up(-(-M // 2), row_align))
        else:
            # v5e/v6e (1 TC): shrink the tile to the problem; no benefit from splitting.
            tile_m = max(row_align, _round_up(M, row_align))

    # Sub-block size: multiple of row_align, must divide the tile.
    sub_m = max(row_align, min(int(sub_m), tile_m))
    if tile_m % sub_m:
        sub_m = tile_m

    # Ragged M: no pad/slice copies — Pallas masks the edge block's writeback.
    grid_m = pl.cdiv(M, tile_m)

    # bf16 operands into the MXU (f32 accumulation inside the kernel);
    # biases stay f32 since they are added on the f32 accumulator.
    flat_params = []
    in_specs = [pl.BlockSpec((tile_m, feat), lambda i: (i, 0))]
    for (w, b) in params:
        flat_params.append(w.astype(compute_dtype))
        flat_params.append(b.reshape(1, -1).astype(jnp.float32))
        # Grid-invariant blocks (constant index_map -> fetched once, no per-step re-DMA).
        # TODO(synk): pipeline_mode=pl.Buffered(1) would halve their (already <1 MiB)
        # double-buffered VMEM footprint; skipped to stay version-portable.
        in_specs.append(pl.BlockSpec(w.shape, lambda i: (0, 0)))
        in_specs.append(pl.BlockSpec((1, b.shape[0]), lambda i: (0, 0)))

    kernel = functools.partial(_mlp_kernel, num_hidden=num_hidden, act=act,
                               sub_m=sub_m, compute_dtype=compute_dtype)

    # Advisory cost estimate so XLA schedules the custom call sensibly when fused.
    flops = 2 * M * sum(w.shape[0] * w.shape[1] for w, _ in params)
    transcendentals = (0 if act == "ReLU"
                       else M * sum(w.shape[1] for w, _ in params[1:-1]))
    bytes_accessed = (M * feat * np.dtype(x2d.dtype).itemsize
                      + sum(w.size * np.dtype(compute_dtype).itemsize + b.size * 4
                            for w, b in params)
                      + M * out_dim * np.dtype(out_dtype).itemsize)

    # VMEM footprint: double-buffered x/out tiles + double-buffered weights/biases.
    vmem_bytes = 2 * tile_m * (feat * np.dtype(x2d.dtype).itemsize
                               + out_dim * np.dtype(out_dtype).itemsize)
    vmem_bytes += 2 * sum(w.size * np.dtype(compute_dtype).itemsize + b.size * 4
                          for w, b in params)
    vmem_limit = max(32 * 1024 * 1024, int(vmem_bytes * 2))

    out2d = pl.pallas_call(
        kernel,
        out_shape=jax.ShapeDtypeStruct((M, out_dim), out_dtype),
        grid_spec=pltpu.PrefetchScalarGridSpec(
            num_scalar_prefetch=0,
            grid=(grid_m,),
            in_specs=in_specs,
            out_specs=pl.BlockSpec((tile_m, out_dim), lambda i: (i, 0)),
        ),
        compiler_params=pltpu.CompilerParams(
            dimension_semantics=("parallel",),
            vmem_limit_bytes=vmem_limit),
        cost_estimate=pl.CostEstimate(flops=flops,
                                      transcendentals=transcendentals,
                                      bytes_accessed=bytes_accessed),
    )(x2d, *flat_params)

    return out2d.reshape(batch, nnb, out_dim)


def init_linear_params(key, in_dim, out_dim):
    """Deterministic PyTorch-style uniform init; W stored as (in_dim, out_dim)."""
    kw, kb = jax.random.split(key)
    bound = 1.0 / jnp.sqrt(jnp.float32(in_dim))
    w = jax.random.uniform(kw, (in_dim, out_dim), jnp.float32, -bound, bound)
    b = jax.random.uniform(kb, (out_dim,), jnp.float32, -bound, bound)
    return w, b


def reference_forward(expression, params, act="ReLU"):
    x = expression
    w, b = params[0]
    x = x @ w + b
    for (w, b) in params[1:-1]:
        x = x @ w + b
        x = _activation(x, act)
    w, b = params[-1]
    x = x @ w + b
    return x


if __name__ == "__main__":
    # Small, TPU-friendly config.
    output_dim = 128                  # number of genes / features
    ae_layer_dims = [256, 128, 256]   # encoder/decoder layer dims
    act = "ReLU"

    key = jax.random.PRNGKey(0)
    keys = jax.random.split(key, 3 + len(ae_layer_dims) + 1)
    k_in = keys[:3]
    k_layers = keys[3:]

    # Build parameter list: pre_mlp_linear, hidden layers, output_layer.
    params = [init_linear_params(k_layers[0], output_dim, ae_layer_dims[0])]
    for i in range(len(ae_layer_dims) - 1):
        params.append(init_linear_params(k_layers[1 + i],
                                         ae_layer_dims[i], ae_layer_dims[i + 1]))
    params.append(init_linear_params(k_layers[len(ae_layer_dims)],
                                     ae_layer_dims[-1], output_dim))

    test_cases = [
        ((2, 8, output_dim), {}),               # nominal tiny use (M=16)
        ((4, 128, output_dim), {}),             # exact multiple, single/dual large tile
        ((4, 70, output_dim), {"tile_m": 256}),  # ragged M -> masked edge block, grid>1
    ]

    for idx, (shape, kw) in enumerate(test_cases):
        expr = jax.random.normal(k_in[idx], shape, jnp.float32)
        ref = reference_forward(expr, params, act=act)

        # f32 compute path: exact-semantics check.
        out_f32 = jax.block_until_ready(
            autoencoder_forward(expr, params, act=act,
                                compute_dtype=jnp.float32, **kw))
        assert out_f32.shape == expr.shape
        assert jnp.allclose(out_f32, ref, atol=2e-4, rtol=2e-4), f"f32 mismatch {shape}"

        # bf16 MXU fast path (f32 accumulation): loose tolerance.
        out_bf16 = jax.block_until_ready(
            autoencoder_forward(expr, params, act=act,
                                compute_dtype=jnp.bfloat16, **kw))
        assert out_bf16.shape == expr.shape
        assert jnp.allclose(out_bf16, ref, atol=1e-1, rtol=1e-1), f"bf16 mismatch {shape}"

    # bf16 output path (halves writeback traffic for downstream bf16 consumers).
    expr = jax.random.normal(k_in[0], (2, 8, output_dim), jnp.float32)
    out_lp = jax.block_until_ready(
        autoencoder_forward(expr, params, act=act, compute_dtype=jnp.bfloat16,
                            out_dtype=jnp.bfloat16))
    assert out_lp.dtype == jnp.bfloat16 and out_lp.shape == expr.shape

    print("KERNEL_OK")
</pallas_src>

<mosaic_0001>
module attributes {stable_mosaic.version = 11 : i64} {
  func.func @_mlp_kernel(%arg0: i32, %arg1: memref<16x128xf32, #tpu.memory_space<vmem>>, %arg2: memref<128x256xf32, #tpu.memory_space<vmem>>, %arg3: memref<1x256xf32, #tpu.memory_space<vmem>>, %arg4: memref<256x128xf32, #tpu.memory_space<vmem>>, %arg5: memref<1x128xf32, #tpu.memory_space<vmem>>, %arg6: memref<128x256xf32, #tpu.memory_space<vmem>>, %arg7: memref<1x256xf32, #tpu.memory_space<vmem>>, %arg8: memref<256x128xf32, #tpu.memory_space<vmem>>, %arg9: memref<1x128xf32, #tpu.memory_space<vmem>>, %arg10: memref<16x128xf32, #tpu.memory_space<vmem>>) attributes {dimension_semantics = [#tpu.dimension_semantics<parallel>], iteration_bounds = array<i64: 1>, scalar_prefetch = 0 : i64, scratch_operands = 0 : i64, tpu.core_type = #tpu.core_type<tc>, window_params = [{transform_indices = @transform_0, window_bounds = array<i64: 16, 128>}, {pipeline_mode = #tpu.pipeline_mode<synchronous>, transform_indices = @transform_1, window_bounds = array<i64: 128, 256>}, {pipeline_mode = #tpu.pipeline_mode<synchronous>, transform_indices = @transform_2, window_bounds = array<i64: 1, 256>}, {pipeline_mode = #tpu.pipeline_mode<synchronous>, transform_indices = @transform_3, window_bounds = array<i64: 256, 128>}, {pipeline_mode = #tpu.pipeline_mode<synchronous>, transform_indices = @transform_4, window_bounds = array<i64: 1, 128>}, {pipeline_mode = #tpu.pipeline_mode<synchronous>, transform_indices = @transform_5, window_bounds = array<i64: 128, 256>}, {pipeline_mode = #tpu.pipeline_mode<synchronous>, transform_indices = @transform_6, window_bounds = array<i64: 1, 256>}, {pipeline_mode = #tpu.pipeline_mode<synchronous>, transform_indices = @transform_7, window_bounds = array<i64: 256, 128>}, {pipeline_mode = #tpu.pipeline_mode<synchronous>, transform_indices = @transform_8, window_bounds = array<i64: 1, 128>}, {transform_indices = @transform_9, window_bounds = array<i64: 16, 128>}]} {
    %c0_i32 = arith.constant 0 : i32
    %c16_i32 = arith.constant 16 : i32
    %0 = arith.muli %c0_i32, %c16_i32 : i32
    %1 = tpu.assume_multiple %0, 16 : i32
    %2 = arith.index_cast %1 : i32 to index
    %c0 = arith.constant 0 : index
    %3 = vector.load %arg1[%2, %c0] : memref<16x128xf32, #tpu.memory_space<vmem>>, vector<16x128xf32>
    %c0_0 = arith.constant 0 : index
    %c0_1 = arith.constant 0 : index
    %4 = vector.load %arg2[%c0_0, %c0_1] : memref<128x256xf32, #tpu.memory_space<vmem>>, vector<128x256xf32>
    %cst = arith.constant dense<0.000000e+00> : vector<16x256xf32>
    %5 = tpu.matmul %3, %4, %cst {dimension_numbers = #tpu.dot_dimension_numbers<[1], [0], [0], [1], [0, 0, 1, 1], [], []>} : vector<16x128xf32>, vector<128x256xf32>, vector<16x256xf32> -> vector<16x256xf32>
    %c0_2 = arith.constant 0 : index
    %c0_3 = arith.constant 0 : index
    %6 = vector.load %arg3[%c0_2, %c0_3] : memref<1x256xf32, #tpu.memory_space<vmem>>, vector<1x256xf32>
    %7 = vector.broadcast %6 : vector<1x256xf32> to vector<16x256xf32>
    %8 = arith.addf %5, %7 : vector<16x256xf32>
    %c0_4 = arith.constant 0 : index
    %c0_5 = arith.constant 0 : index
    %9 = vector.load %arg4[%c0_4, %c0_5] : memref<256x128xf32, #tpu.memory_space<vmem>>, vector<256x128xf32>
    %cst_6 = arith.constant dense<0.000000e+00> : vector<16x128xf32>
    %10 = tpu.matmul %8, %9, %cst_6 {dimension_numbers = #tpu.dot_dimension_numbers<[1], [0], [0], [1], [0, 0, 1, 1], [], []>} : vector<16x256xf32>, vector<256x128xf32>, vector<16x128xf32> -> vector<16x128xf32>
    %c0_7 = arith.constant 0 : index
    %c0_8 = arith.constant 0 : index
    %11 = vector.load %arg5[%c0_7, %c0_8] : memref<1x128xf32, #tpu.memory_space<vmem>>, vector<1x128xf32>
    %12 = vector.broadcast %11 : vector<1x128xf32> to vector<16x128xf32>
    %13 = arith.addf %10, %12 : vector<16x128xf32>
    %cst_9 = arith.constant 0.000000e+00 : f32
    %14 = vector.broadcast %cst_9 : f32 to vector<16x128xf32>
    %15 = arith.maximumf %13, %14 : vector<16x128xf32>
    %c0_10 = arith.constant 0 : index
    %c0_11 = arith.constant 0 : index
    %16 = vector.load %arg6[%c0_10, %c0_11] : memref<128x256xf32, #tpu.memory_space<vmem>>, vector<128x256xf32>
    %cst_12 = arith.constant dense<0.000000e+00> : vector<16x256xf32>
    %17 = tpu.matmul %15, %16, %cst_12 {dimension_numbers = #tpu.dot_dimension_numbers<[1], [0], [0], [1], [0, 0, 1, 1], [], []>} : vector<16x128xf32>, vector<128x256xf32>, vector<16x256xf32> -> vector<16x256xf32>
    %c0_13 = arith.constant 0 : index
    %c0_14 = arith.constant 0 : index
    %18 = vector.load %arg7[%c0_13, %c0_14] : memref<1x256xf32, #tpu.memory_space<vmem>>, vector<1x256xf32>
    %19 = vector.broadcast %18 : vector<1x256xf32> to vector<16x256xf32>
    %20 = arith.addf %17, %19 : vector<16x256xf32>
    %cst_15 = arith.constant 0.000000e+00 : f32
    %21 = vector.broadcast %cst_15 : f32 to vector<16x256xf32>
    %22 = arith.maximumf %20, %21 : vector<16x256xf32>
    %c0_16 = arith.constant 0 : index
    %c0_17 = arith.constant 0 : index
    %23 = vector.load %arg8[%c0_16, %c0_17] : memref<256x128xf32, #tpu.memory_space<vmem>>, vector<256x128xf32>
    %cst_18 = arith.constant dense<0.000000e+00> : vector<16x128xf32>
    %24 = tpu.matmul %22, %23, %cst_18 {dimension_numbers = #tpu.dot_dimension_numbers<[1], [0], [0], [1], [0, 0, 1, 1], [], []>} : vector<16x256xf32>, vector<256x128xf32>, vector<16x128xf32> -> vector<16x128xf32>
    %c0_19 = arith.constant 0 : index
    %c0_20 = arith.constant 0 : index
    %25 = vector.load %arg9[%c0_19, %c0_20] : memref<1x128xf32, #tpu.memory_space<vmem>>, vector<1x128xf32>
    %26 = vector.broadcast %25 : vector<1x128xf32> to vector<16x128xf32>
    %27 = arith.addf %24, %26 : vector<16x128xf32>
    %28 = arith.index_cast %1 : i32 to index
    %c0_21 = arith.constant 0 : index
    %29 = vector.load %arg10[%28, %c0_21] : memref<16x128xf32, #tpu.memory_space<vmem>>, vector<16x128xf32>
    tpu.vector_store %arg10[%28, %c0_21], %27 {strides = array<i32>} : memref<16x128xf32, #tpu.memory_space<vmem>>, vector<16x128xf32>,
    %c1_i32 = arith.constant 1 : i32
    return
  }
  func.func @transform_0(%arg0: i32) -> (i32, i32) {
    %c0_i32 = arith.constant 0 : i32
    %c0_i32_0 = arith.constant 0 : i32
    return %arg0, %c0_i32 : i32, i32
  }
  func.func @transform_1(%arg0: i32) -> (i32, i32) {
    %c0_i32 = arith.constant 0 : i32
    %c0_i32_0 = arith.constant 0 : i32
    %c0_i32_1 = arith.constant 0 : i32
    return %c0_i32, %c0_i32_0 : i32, i32
  }
  func.func @transform_2(%arg0: i32) -> (i32, i32) {
    %c0_i32 = arith.constant 0 : i32
    %c0_i32_0 = arith.constant 0 : i32
    %c0_i32_1 = arith.constant 0 : i32
    return %c0_i32, %c0_i32_0 : i32, i32
  }
  func.func @transform_3(%arg0: i32) -> (i32, i32) {
    %c0_i32 = arith.constant 0 : i32
    %c0_i32_0 = arith.constant 0 : i32
    %c0_i32_1 = arith.constant 0 : i32
    return %c0_i32, %c0_i32_0 : i32, i32
  }
  func.func @transform_4(%arg0: i32) -> (i32, i32) {
    %c0_i32 = arith.constant 0 : i32
    %c0_i32_0 = arith.constant 0 : i32
    %c0_i32_1 = arith.constant 0 : i32
    return %c0_i32, %c0_i32_0 : i32, i32
  }
  func.func @transform_5(%arg0: i32) -> (i32, i32) {
    %c0_i32 = arith.constant 0 : i32
    %c0_i32_0 = arith.constant 0 : i32
    %c0_i32_1 = arith.constant 0 : i32
    return %c0_i32, %c0_i32_0 : i32, i32
  }
  func.func @transform_6(%arg0: i32) -> (i32, i32) {
    %c0_i32 = arith.constant 0 : i32
    %c0_i32_0 = arith.constant 0 : i32
    %c0_i32_1 = arith.constant 0 : i32
    return %c0_i32, %c0_i32_0 : i32, i32
  }
  func.func @transform_7(%arg0: i32) -> (i32, i32) {
    %c0_i32 = arith.constant 0 : i32
    %c0_i32_0 = arith.constant 0 : i32
    %c0_i32_1 = arith.constant 0 : i32
    return %c0_i32, %c0_i32_0 : i32, i32
  }
  func.func @transform_8(%arg0: i32) -> (i32, i32) {
    %c0_i32 = arith.constant 0 : i32
    %c0_i32_0 = arith.constant 0 : i32
    %c0_i32_1 = arith.constant 0 : i32
    return %c0_i32, %c0_i32_0 : i32, i32
  }
  func.func @transform_9(%arg0: i32) -> (i32, i32) {
    %c0_i32 = arith.constant 0 : i32
    %c0_i32_0 = arith.constant 0 : i32
    return %arg0, %c0_i32 : i32, i32
  }
}

</mosaic_0001>

<bundles_post_ra>
// kernel: tpu_custom_call.1
= control target key start
LH: loop header
LB: loop body
LE: loop exit
PB: predicated region body
PF: predicated region fallthrough
CT: control target
= control target key end

     0   :  { %14 = vsyncpa [#allocation3], 0  ;;  %s936_s0 = inlined_call_operand.hbm [shape: f32[16,128], index: 0, kind: input, shape index: {}]   ;;  %s937_s1 = inlined_call_operand.hbm [shape: f32[128,256], index: 1, kind: input, shape index: {}]   ;;  %s938_s2 = inlined_call_operand.vmem [shape: f32[1,256], index: 2, kind: input, shape index: {}]   ;;  %s939_s3 = inlined_call_operand.hbm [shape: f32[256,128], index: 3, kind: input, shape index: {}]   ;;  %s940_s4 = inlined_call_operand.vmem [shape: f32[1,128], index: 4, kind: input, shape index: {}]   ;;  %s941_s5 = inlined_call_operand.hbm [shape: f32[128,256], index: 5, kind: input, shape index: {}]   ;;  %s942_s6 = inlined_call_operand.vmem [shape: f32[1,256], index: 6, kind: input, shape index: {}]   ;;  %s943_s7 = inlined_call_operand.hbm [shape: f32[256,128], index: 7, kind: input, shape index: {}]   ;;  %s944_s8 = inlined_call_operand.vmem [shape: f32[1,128], index: 8, kind: input, shape index: {}]   ;;  %s945_s9 = inlined_call_operand.hbm [shape: f32[16,128], index: 9, kind: output, shape index: {}]  }
   0x1   :  { %15 = vsyncpa [#allocation6], 0 }
   0x2   :  { %16 = vsyncpa [#allocation9], 0 }
   0x3   :  { %17 = vsyncpa [#allocation4], 0  ;;  %s817_s30 = smov [#allocation5]  }
   0x4   :  { %s35_s10 = sshll.u32 %s817_s30, 4  ;;  %s36_s10 = int_to_ptr.vmem [resolvable:$true] %s35_s10 }
   0x5   :  { %s697_s11 = scalar_lea.vmem %s36_s10, 4096  ;;  %p702_p1 = scmp.lt.s32.totalorder %s36_s10, %s36_s10 }
   0x6   :  { %p698_p0 = scmp.ne.s32.totalorder %s36_s10, %s697_s11  ;;  %p703_p2 = scmp.lt.s32.totalorder %s697_s11, %s697_s11 }
   0x8   :  { %p704_p3 = por %p703_p2, %p702_p1 }
   0xa   :  { %p705_p4 = pnand %p704_p3, %p698_p0 }
   0xc   :  { %708 = shalt.err (!%p705_p4)
}
   0xd   :  { %s818_s12 = smov 256   ;;  %s819_s13 = smov 16  }
   0xe   :  { %41 = dma.hbm_to_vmem [thread:$0]  %s937_s1, 4096, %s36_s10, [#allocation6], %s818_s12, %s818_s12, %s819_s13  }
   0xf   :  { %s820_s16 = smov [#allocation8]   ;;  %s821_s18 = smov [#allocation2]  }
  0x10   :  { %s63_s17 = sshll.u32 %s820_s16, 4  ;;  %s23_s19 = sshll.u32 %s821_s18, 4  ;;  %s64_s17 = int_to_ptr.vmem [resolvable:$true] %s63_s17  ;;  %s24_s19 = int_to_ptr.vmem [resolvable:$true] %s23_s19 }
  0x11   :  { %s717_s20 = scalar_lea.vmem %s64_s17, 4096  ;;  %p722_p6 = scmp.lt.s32.totalorder %s64_s17, %s64_s17 }
  0x12   :  { %p718_p5 = scmp.ne.s32.totalorder %s64_s17, %s717_s20  ;;  %p723_p7 = scmp.lt.s32.totalorder %s717_s20, %s717_s20 }
  0x14   :  { %p724_p8 = por %p723_p7, %p722_p6 }
  0x16   :  { %p725_p9 = pnand %p724_p8, %p718_p5 }
  0x18   :  { %728 = shalt.err (!%p725_p9)
}
  0x19   :  { %69 = dma.hbm_to_vmem [thread:$0]  %s941_s5, 4096, %s64_s17, [#allocation9], %s818_s12, %s818_s12, %s819_s13  }
  0x1a   :  { %s737_s23 = scalar_lea.vmem %s24_s19, 256  ;;  %p742_p11 = scmp.lt.s32.totalorder %s24_s19, %s24_s19 }
  0x1b   :  { %p738_p10 = scmp.ne.s32.totalorder %s24_s19, %s737_s23  ;;  %p743_p12 = scmp.lt.s32.totalorder %s737_s23, %s737_s23 }
  0x1d   :  { %p744_p13 = por %p743_p12, %p742_p11 }
  0x1f   :  { %p745_p0 = pnand %p744_p13, %p738_p10 }
  0x21   :  { %748 = shalt.err (!%p745_p0)
}
  0x22   :  { %s822_s1 = smov 128   ;;  %s823_s24 = smov 8  }
  0x23   :  { %29 = dma.hbm_to_vmem [thread:$0]  %s936_s0, 256, %s24_s19, [#allocation3], %s822_s1, %s822_s1, %s823_s24  }
  0x24   :  { %s824_s27 = smov [#allocation7]   ;;  %s825_s5 = smov [#allocation10]  }
  0x25   :  { %s49_s28 = sshll.u32 %s824_s27, 4  ;;  %s77_s29 = sshll.u32 %s825_s5, 4  ;;  %s50_s28 = int_to_ptr.vmem [resolvable:$true] %s49_s28  ;;  %s78_s29 = int_to_ptr.vmem [resolvable:$true] %s77_s29 }
  0x26   :  { %s757_s30 = scalar_lea.vmem %s50_s28, 4096  ;;  %p762_p2 = scmp.lt.s32.totalorder %s50_s28, %s50_s28 }
  0x27   :  { %p758_p1 = scmp.ne.s32.totalorder %s50_s28, %s757_s30  ;;  %p763_p3 = scmp.lt.s32.totalorder %s757_s30, %s757_s30 }
  0x29   :  { %p764_p4 = por %p763_p3, %p762_p2 }
  0x2b   :  { %p765_p5 = pnand %p764_p4, %p758_p1 }
  0x2d   :  { %768 = shalt.err (!%p765_p5)
}
  0x2e   :  { %55 = dma.hbm_to_vmem [thread:$0]  %s939_s3, 4096, %s50_s28, [#allocation6], %s822_s1, %s822_s1, %s823_s24  }
  0x2f   :  { %s777_s0 = scalar_lea.vmem %s78_s29, 4096  ;;  %p782_p7 = scmp.lt.s32.totalorder %s78_s29, %s78_s29 }
  0x30   :  { %p778_p6 = scmp.ne.s32.totalorder %s78_s29, %s777_s0  ;;  %p783_p8 = scmp.lt.s32.totalorder %s777_s0, %s777_s0 }
  0x32   :  { %p784_p9 = por %p783_p8, %p782_p7 }
  0x34   :  { %p785_p10 = pnand %p784_p9, %p778_p6 }
  0x36   :  { %788 = shalt.err (!%p785_p10)
}
  0x37   :  { %83 = dma.hbm_to_vmem [thread:$0]  %s943_s7, 4096, %s78_s29, [#allocation9], %s822_s1, %s822_s1, %s823_s24  }
  0x38   :  { %809 = dma.done.wait [#allocation3], 256  }
  0x39   :  { %810 = vsyncadd [#allocation3], 4294967040 }
  0x3a   :  { %811 = dma.done.wait [#allocation6], 8192  }
  0x3b   :  { %812 = vsyncadd [#allocation6], 4294959104 }
  0x3c   :  { %813 = dma.done.wait [#allocation9], 8192  }
  0x3d   :  { %814 = vsyncadd [#allocation9], 4294959104  ;;  %v826_v0 = vmov 0.0   ;;  %v134_v1 = vld [vmem:[#allocation5 + $0xf8] sm:$0xff]  ;;  %v133_v2 = vld [vmem:[#allocation5 + $0xf0] sm:$0xff]  ;;  %s827_s17 = smov [#allocation11]  }
  0x3e   :  { %211 = vmatprep.mubr.f32.mxu0 %v826_v0  ;;  %v132_v3 = vld [vmem:[#allocation5 + $0xe8] sm:$0xff]  ;;  %147 = vmatprep.subr.mxu0 %v134_v1  ;;  %v131_v4 = vld [vmem:[#allocation5 + $0xe0] sm:$0xff]  ;;  %v130_v5 = vld [vmem:[#allocation5 + $0xd8] sm:$0xff]  ;;  %s586_s18 = sshll.u32 %s827_s17, 4  ;;  %s587_s18 = int_to_ptr.vmem [resolvable:$true] %s586_s18 }
  0x3f   :  { %148 = vmatpush1.msra.mxu0 %v133_v2  ;;  %v129_v6 = vld [vmem:[#allocation5 + $0xd0] sm:$0xff]  ;;  %v128_v7 = vld [vmem:[#allocation5 + $0xc8] sm:$0xff]  ;;  %v127_v8 = vld [vmem:[#allocation5 + $0xc0] sm:$0xff]  ;;  %s789_s19 = scalar_lea.vmem %s587_s18, 256  ;;  %p794_p12 = scmp.lt.s32.totalorder %s587_s18, %s587_s18 }
  0x40   :  { %149 = vmatprep.subr.mxu0 %v132_v3  ;;  %v126_v9 = vld [vmem:[#allocation5 + $0xb8] sm:$0xff]  ;;  %v125_v10 = vld [vmem:[#allocation5 + $0xb0] sm:$0xff]  ;;  %v124_v11 = vld [vmem:[#allocation5 + $0xa8] sm:$0xff]  ;;  %p790_p11 = scmp.ne.s32.totalorder %s587_s18, %s789_s19  ;;  %p795_p13 = scmp.lt.s32.totalorder %s789_s19, %s789_s19 }
  0x41   :  { %150 = vmatpush1.msra.mxu0 %v131_v4  ;;  %v123_v12 = vld [vmem:[#allocation5 + $0xa0] sm:$0xff]  ;;  %v122_v13 = vld [vmem:[#allocation5 + $0x98] sm:$0xff]  ;;  %v121_v14 = vld [vmem:[#allocation5 + $0x90] sm:$0xff] }
  0x42   :  { %151 = vmatprep.subr.mxu0 %v130_v5  ;;  %v255_v15 = vld [vmem:[#allocation7 + $0xf8] sm:$0xff]  ;;  %v120_v17 = vld [vmem:[#allocation5 + $0x88] sm:$0xff]  ;;  %v254_v18 = vld [vmem:[#allocation7 + $0xf0] sm:$0xff]  ;;  %p796_p0 = por %p795_p13, %p794_p12 }
  0x43   :  { %152 = vmatpush1.msra.mxu0 %v129_v6  ;;  %v239_v16 = vld [vmem:[#allocation7 + $0x78] sm:$0xff]  ;;  %602 = vmatprep.subr.mxu1 %v255_v15  ;;  %v238_v19 = vld [vmem:[#allocation7 + $0x70] sm:$0xff]  ;;  %v119_v20 = vld [vmem:[#allocation5 + $0x80] sm:$0xff] }
  0x44   :  { %153 = vmatprep.subr.mxu0 %v128_v7  ;;  %603 = vmatpush3.msra.mxu1 %v239_v16  ;;  %v253_v21 = vld [vmem:[#allocation7 + $0xe8] sm:$0xff]  ;;  %v118_v22 = vld [vmem:[#allocation5 + $0x78] sm:$0xff]  ;;  %v117_v24 = vld [vmem:[#allocation5 + $0x70] sm:$0xff]  ;;  %p797_p1 = pnand %p796_p0, %p790_p11 }
  0x45   :  { %154 = vmatpush1.msra.mxu0 %v127_v8  ;;  %604 = vmatprep.subr.mxu1 %v254_v18  ;;  %v237_v23 = vld [vmem:[#allocation7 + $0x68] sm:$0xff]  ;;  %v252_v25 = vld [vmem:[#allocation7 + $0xe0] sm:$0xff]  ;;  %v251_v29 = vld [vmem:[#allocation7 + $0xd8] sm:$0xff] }
  0x46   :  { %155 = vmatprep.subr.mxu0 %v126_v9  ;;  %605 = vmatpush3.msra.mxu1 %v238_v19  ;;  %v116_v26 = vld [vmem:[#allocation5 + $0x68] sm:$0xff]  ;;  %v236_v27 = vld [vmem:[#allocation7 + $0x60] sm:$0xff]  ;;  %v114_v30 = vld [vmem:[#allocation5 + $0x58] sm:$0xff] }
  0x47   :  { %156 = vmatpush1.msra.mxu0 %v125_v10  ;;  %606 = vmatprep.subr.mxu1 %v253_v21  ;;  %v115_v28 = vld [vmem:[#allocation5 + $0x60] sm:$0xff]  ;;  %v235_v31 = vld [vmem:[#allocation7 + $0x58] sm:$0xff]  ;;  %v113_v32 = vld [vmem:[#allocation5 + $0x50] sm:$0xff] }
  0x48   :  { %157 = vmatprep.subr.mxu0 %v124_v11  ;;  %607 = vmatpush3.msra.mxu1 %v237_v23  ;;  %v250_v33 = vld [vmem:[#allocation7 + $0xd0] sm:$0xff]  ;;  %v112_v34 = vld [vmem:[#allocation5 + $0x48] sm:$0xff]  ;;  %v111_v36 = vld [vmem:[#allocation5 + $0x40] sm:$0xff] }
  0x49   :  { %158 = vmatpush1.msra.mxu0 %v123_v12  ;;  %608 = vmatprep.subr.mxu1 %v252_v25  ;;  %v234_v35 = vld [vmem:[#allocation7 + $0x50] sm:$0xff]  ;;  %v249_v37 = vld [vmem:[#allocation7 + $0xc8] sm:$0xff]  ;;  %v110_v38 = vld [vmem:[#allocation5 + $0x38] sm:$0xff] }
  0x4a   :  { %159 = vmatprep.subr.mxu0 %v122_v13  ;;  %609 = vmatpush3.msra.mxu1 %v236_v27  ;;  %v233_v39 = vld [vmem:[#allocation7 + $0x48] sm:$0xff]  ;;  %v109_v40 = vld [vmem:[#allocation5 + $0x30] sm:$0xff]  ;;  %v248_v41 = vld [vmem:[#allocation7 + $0xc0] sm:$0xff]  ;;  %v137_v27 = vlaneseq }
  0x4b   :  { %160 = vmatpush1.msra.mxu0 %v121_v14  ;;  %610 = vmatprep.subr.mxu1 %v251_v29  ;;  %v108_v42 = vld [vmem:[#allocation5 + $0x28] sm:$0xff]  ;;  %v232_v43 = vld [vmem:[#allocation7 + $0x40] sm:$0xff]  ;;  %v247_v45 = vld [vmem:[#allocation7 + $0xb8] sm:$0xff] }
  0x4c   :  { %161 = vmatprep.subr.mxu0 %v120_v17  ;;  %611 = vmatpush3.msra.mxu1 %v235_v31  ;;  %v107_v44 = vld [vmem:[#allocation5 + $0x20] sm:$0xff]  ;;  %v106_v46 = vld [vmem:[#allocation5 + $0x18] sm:$0xff]  ;;  %v105_v48 = vld [vmem:[#allocation5 + $0x10] sm:$0xff] }
  0x4d   :  { %162 = vmatpush1.msra.mxu0 %v119_v20  ;;  %612 = vmatprep.subr.mxu1 %v250_v33  ;;  %v231_v47 = vld [vmem:[#allocation7 + $0x38] sm:$0xff]  ;;  %v246_v49 = vld [vmem:[#allocation7 + $0xb0] sm:$0xff]  ;;  %v104_v50 = vld [vmem:[#allocation5 + $0x8] sm:$0xff] }
  0x4e   :  { %163 = vmatprep.subr.mxu0 %v118_v22  ;;  %613 = vmatpush3.msra.mxu1 %v234_v35  ;;  %v230_v51 = vld [vmem:[#allocation7 + $0x30] sm:$0xff]  ;;  %v103_v52 = vld [vmem:[#allocation5] sm:$0xff]  ;;  %v245_v53 = vld [vmem:[#allocation7 + $0xa8] sm:$0xff] }
  0x4f   :  { %164 = vmatpush1.msra.mxu0 %v117_v24  ;;  %614 = vmatprep.subr.mxu1 %v249_v37  ;;  %v101_v54 = vld [vmem:[#allocation2] sm:$0xff]  ;;  %v229_v55 = vld [vmem:[#allocation7 + $0x28] sm:$0xff]  ;;  %v244_v56 = vld [vmem:[#allocation7 + $0xa0] sm:$0xff] }
  0x50   :  { %165 = vmatprep.subr.mxu0 %v116_v26  ;;  %615 = vmatpush3.msra.mxu1 %v233_v39  ;;  %v228_v57 = vld [vmem:[#allocation7 + $0x20] sm:$0xff]  ;;  %v243_v58 = vld [vmem:[#allocation7 + $0x98] sm:$0xff]  ;;  %v242_v61 = vld [vmem:[#allocation7 + $0x90] sm:$0xff] }
  0x51   :  { %166 = vmatpush1.msra.mxu0 %v115_v28  ;;  %616 = vmatprep.subr.mxu1 %v248_v41  ;;  %v102_v59 = vld [vmem:[#allocation2 + $0x8] sm:$0xff]  ;;  %v226_v62 = vld [vmem:[#allocation7 + $0x10] sm:$0xff]  ;;  %v241_v63 = vld [vmem:[#allocation7 + $0x88] sm:$0xff]  ;;  %v905_v28 = vshrl.u32 %v137_v27, 7 }
  0x52   :  { %167 = vmatprep.subr.mxu0 %v114_v30  ;;  %617 = vmatpush3.msra.mxu1 %v232_v43  ;;  %v227_v60 = vld [vmem:[#allocation7 + $0x18] sm:$0xff]  ;;  %v225_v1 = vld [vmem:[#allocation7 + $0x8] sm:$0xff]  ;;  %v240_v2 = vld [vmem:[#allocation7 + $0x80] sm:$0xff] }
  0x53   :  { %168 = vmatpush1.msra.mxu0 %v113_v32  ;;  %618 = vmatprep.subr.mxu1 %v247_v45  ;;  %v224_v3 = vld [vmem:[#allocation7] sm:$0xff]  ;;  %v371_v4 = vld [vmem:[#allocation8 + $0xf8] sm:$0xff]  ;;  %v370_v5 = vld [vmem:[#allocation8 + $0xf0] sm:$0xff]  ;;  %v143_v29 = vsub.s32 1, %v905_v28  ;;  %v139_v30 = vsub.s32 0, %v905_v28 }
  0x54   :  { %169 = vmatprep.subr.mxu0 %v112_v34  ;;  %619 = vmatpush3.msra.mxu1 %v231_v47  ;;  %v369_v6 = vld [vmem:[#allocation8 + $0xe8] sm:$0xff]  ;;  %v368_v7 = vld [vmem:[#allocation8 + $0xe0] sm:$0xff]  ;;  %v367_v8 = vld [vmem:[#allocation8 + $0xd8] sm:$0xff] }
  0x55   :  { %170 = vmatpush1.msra.mxu0 %v111_v36  ;;  %620 = vmatprep.subr.mxu1 %v246_v49  ;;  %v366_v9 = vld [vmem:[#allocation8 + $0xd0] sm:$0xff]  ;;  %v365_v10 = vld [vmem:[#allocation8 + $0xc8] sm:$0xff]  ;;  %v364_v11 = vld [vmem:[#allocation8 + $0xc0] sm:$0xff] }
  0x56   :  { %171 = vmatprep.subr.mxu0 %v110_v38  ;;  %621 = vmatpush3.msra.mxu1 %v230_v51  ;;  %v363_v12 = vld [vmem:[#allocation8 + $0xb8] sm:$0xff]  ;;  %v362_v13 = vld [vmem:[#allocation8 + $0xb0] sm:$0xff]  ;;  %v361_v14 = vld [vmem:[#allocation8 + $0xa8] sm:$0xff] }
  0x57   :  { %172 = vmatpush1.msra.mxu0 %v109_v40  ;;  %622 = vmatprep.subr.mxu1 %v245_v53  ;;  %v360_v15 = vld [vmem:[#allocation8 + $0xa0] sm:$0xff]  ;;  %v359_v16 = vld [vmem:[#allocation8 + $0x98] sm:$0xff]  ;;  %v358_v17 = vld [vmem:[#allocation8 + $0x90] sm:$0xff] }
  0x58   :  { %173 = vmatprep.subr.mxu0 %v108_v42  ;;  %623 = vmatpush3.msra.mxu1 %v229_v55  ;;  %v357_v18 = vld [vmem:[#allocation8 + $0x88] sm:$0xff]  ;;  %v356_v19 = vld [vmem:[#allocation8 + $0x80] sm:$0xff]  ;;  %v355_v20 = vld [vmem:[#allocation8 + $0x78] sm:$0xff] }
  0x59   :  { %174 = vmatpush1.msra.mxu0 %v107_v44  ;;  %624 = vmatprep.subr.mxu1 %v244_v56  ;;  %v354_v21 = vld [vmem:[#allocation8 + $0x70] sm:$0xff]  ;;  %v353_v22 = vld [vmem:[#allocation8 + $0x68] sm:$0xff]  ;;  %v352_v23 = vld [vmem:[#allocation8 + $0x60] sm:$0xff] }
  0x5a   :  { %175 = vmatprep.subr.mxu0 %v106_v46  ;;  %625 = vmatpush3.msra.mxu1 %v228_v57  ;;  %v351_v24 = vld [vmem:[#allocation8 + $0x58] sm:$0xff]  ;;  %v350_v25 = vld [vmem:[#allocation8 + $0x50] sm:$0xff]  ;;  %v349_v26 = vld [vmem:[#allocation8 + $0x48] sm:$0xff] }
  0x5b   :  { %176 = vmatpush1.msra.mxu0 %v105_v48  ;;  %626 = vmatprep.subr.mxu1 %v243_v58  ;;  %v135_v31 = vld [vmem:[%s938_s2] sm:$0x3]  ;;  %v348_v42 = vld [vmem:[#allocation8 + $0x40] sm:$0xff]  ;;  %v347_v43 = vld [vmem:[#allocation8 + $0x38] sm:$0xff] }
  0x5c   :  { %177 = vmatprep.subr.mxu0 %v104_v50  ;;  %627 = vmatpush3.msra.mxu1 %v227_v60  ;;  %v144_v32 = vrot.slane %v135_v31, %v143_v29  ;;  %v140_v33 = vrot.slane %v135_v31, %v139_v30  ;;  %v346_v44 = vld [vmem:[#allocation8 + $0x30] sm:$0xff]  ;;  %v345_v45 = vld [vmem:[#allocation8 + $0x28] sm:$0xff]  ;;  %v344_v46 = vld [vmem:[#allocation8 + $0x20] sm:$0xff] }
  0x5d   :  { %178 = vmatpush1.msra.mxu0 %v103_v52  ;;  %628 = vmatprep.subr.mxu1 %v242_v61  ;;  %v343_v47 = vld [vmem:[#allocation8 + $0x18] sm:$0xff]  ;;  %v342_v48 = vld [vmem:[#allocation8 + $0x10] sm:$0xff]  ;;  %v341_v49 = vld [vmem:[#allocation8 + $0x8] sm:$0xff] }
  0x5e   :  { %212 = vmatmul.mubr.f32.vlgmr.msra.gmra.mxu0 %v101_v54  ;;  %629 = vmatpush3.msra.mxu1 %v226_v62  ;;  %v340_v50 = vld [vmem:[#allocation8] sm:$0xff]  ;;  %v496_v51 = vld [vmem:[#allocation10 + $0xf8] sm:$0xff]  ;;  %v495_v53 = vld [vmem:[#allocation10 + $0xf0] sm:$0xff] }
  0x5f   :  { %217 = vmatprep.mubr.f32.mxu0 %v826_v0  ;;  %630 = vmatprep.subr.mxu1 %v241_v63  ;;  %v480_v52 = vld [vmem:[#allocation10 + $0x78] sm:$0xff]  ;;  %v479_v54 = vld [vmem:[#allocation10 + $0x70] sm:$0xff]  ;;  %v494_v55 = vld [vmem:[#allocation10 + $0xe8] sm:$0xff] }
  0x60   :  { %631 = vmatpush3.msra.mxu1 %v225_v1  ;;  %384 = vmatprep.subr.mxu0 %v371_v4  ;;  %v478_v56 = vld [vmem:[#allocation10 + $0x68] sm:$0xff]  ;;  %v493_v57 = vld [vmem:[#allocation10 + $0xe0] sm:$0xff]  ;;  %v476_v60 = vld [vmem:[#allocation10 + $0x58] sm:$0xff] }
  0x61   :  { %632 = vmatprep.subr.mxu1 %v240_v2  ;;  %385 = vmatpush1.msra.mxu0 %v370_v5  ;;  %v477_v58 = vld [vmem:[#allocation10 + $0x60] sm:$0xff]  ;;  %v491_v61 = vld [vmem:[#allocation10 + $0xd0] sm:$0xff]  ;;  %v490_v63 = vld [vmem:[#allocation10 + $0xc8] sm:$0xff] }
  0x62   :  { %218 = vmatmul.mubr.f32.gmra.mxu0 %v102_v59  ;;  %633 = vmatpush3.msra.mxu1 %v224_v3  ;;  %v492_v59 = vld [vmem:[#allocation10 + $0xd8] sm:$0xff]  ;;  %v475_v62 = vld [vmem:[#allocation10 + $0x50] sm:$0xff]  ;;  %v474_v1 = vld [vmem:[#allocation10 + $0x48] sm:$0xff] }
  0x63   :  { %448 = vmatprep.mubr.f32.mxu0 %v826_v0  ;;  %386 = vmatprep.subr.mxu0 %v369_v6  ;;  %v489_v2 = vld [vmem:[#allocation10 + $0xc0] sm:$0xff]  ;;  %v488_v4 = vld [vmem:[#allocation10 + $0xb8] sm:$0xff]  ;;  %v487_v6 = vld [vmem:[#allocation10 + $0xb0] sm:$0xff] }
  0x64   :  { %387 = vmatpush1.msra.mxu0 %v368_v7  ;;  %640 = vmatprep.subr.mxu1 %v496_v51  ;;  %v473_v3 = vld [vmem:[#allocation10 + $0x40] sm:$0xff]  ;;  %v472_v5 = vld [vmem:[#allocation10 + $0x38] sm:$0xff]  ;;  %v471_v7 = vld [vmem:[#allocation10 + $0x30] sm:$0xff] }
  0x65   :  { %388 = vmatprep.subr.mxu0 %v367_v8  ;;  %v486_v8 = vld [vmem:[#allocation10 + $0xa8] sm:$0xff]  ;;  %v601_v28 = vld [vmem:[%s944_s8] ss:$0 sm:$0xff] }
  0x66   :  { %389 = vmatpush1.msra.mxu0 %v366_v9  ;;  %v470_v9 = vld [vmem:[#allocation10 + $0x28] sm:$0xff] }
  0x67   :  { %390 = vmatprep.subr.mxu0 %v365_v10  ;;  %v485_v10 = vld [vmem:[#allocation10 + $0xa0] sm:$0xff]  ;;  %v482_v27 = vld [vmem:[#allocation10 + $0x88] sm:$0xff] }
  0x68   :  { %391 = vmatpush1.msra.mxu0 %v364_v11  ;;  %v469_v11 = vld [vmem:[#allocation10 + $0x20] sm:$0xff]  ;;  %v466_v31 = vld [vmem:[#allocation10 + $0x8] sm:$0xff] }
  0x69   :  { %392 = vmatprep.subr.mxu0 %v363_v12 }
  0x6a   :  { %393 = vmatpush1.msra.mxu0 %v362_v13  ;;  %v600_v13 = vld [vmem:[%s940_s4] ss:$0 sm:$0xff] }
  0x6b   :  { %394 = vmatprep.subr.mxu0 %v361_v14 }
  0x6c   :  { %395 = vmatpush1.msra.mxu0 %v360_v15 }
  0x6d   :  { %396 = vmatprep.subr.mxu0 %v359_v16 }
  0x6e   :  { %397 = vmatpush1.msra.mxu0 %v358_v17 }
  0x6f   :  { %398 = vmatprep.subr.mxu0 %v357_v18 }
  0x70   :  { %399 = vmatpush1.msra.mxu0 %v356_v19 }
  0x71   :  { %400 = vmatprep.subr.mxu0 %v355_v20 }
  0x72   :  { %401 = vmatpush1.msra.mxu0 %v354_v21 }
  0x73   :  { %402 = vmatprep.subr.mxu0 %v353_v22 }
  0x74   :  { %403 = vmatpush1.msra.mxu0 %v352_v23  ;;  %v484_v23 = vld [vmem:[#allocation10 + $0x98] sm:$0xff] }
  0x75   :  { %404 = vmatprep.subr.mxu0 %v351_v24  ;;  %v468_v24 = vld [vmem:[#allocation10 + $0x18] sm:$0xff] }
  0x76   :  { %405 = vmatpush1.msra.mxu0 %v350_v25  ;;  %v483_v25 = vld [vmem:[#allocation10 + $0x90] sm:$0xff] }
  0x77   :  { %406 = vmatprep.subr.mxu0 %v349_v26  ;;  %v467_v26 = vld [vmem:[#allocation10 + $0x10] sm:$0xff] }
  0x78   :  { %407 = vmatpush1.msra.mxu0 %v348_v42 }
  0x79   :  { %408 = vmatprep.subr.mxu0 %v347_v43 }
  0x7a   :  { %409 = vmatpush1.msra.mxu0 %v346_v44 }
  0x7b   :  { %410 = vmatprep.subr.mxu0 %v345_v45 }
  0x7c   :  { %411 = vmatpush1.msra.mxu0 %v344_v46 }
  0x7d   :  { %412 = vmatprep.subr.mxu0 %v343_v47 }
  0x7e   :  { %413 = vmatpush1.msra.mxu0 %v342_v48 }
  0x7f   :  { %414 = vmatprep.subr.mxu0 %v341_v49 }
  0x80   :  { %415 = vmatpush1.msra.mxu0 %v340_v50 }
 0x11e   :  { %v213_v34 = vpop.f32.mrf.mxu0 }
 0x11f   :  { %v214_v37 = vadd.f32 %v213_v34, %v140_v33 }
 0x120   :  { %v215_v35 = vpop.f32.mrf.mxu0 }
 0x121   :  { %v216_v36 = vadd.f32 %v215_v35, %v144_v32 }
 0x122   :  { %v219_v38 = vpop.f32.mrf.mxu0 }
 0x123   :  { %327 = vmatprep.mubr.f32.mxu1 %v216_v36  ;;  %v220_v41 = vadd.f32 %v219_v38, %v140_v33  ;;  %v465_v33 = vld [vmem:[#allocation10] sm:$0xff] }
 0x124   :  { %v221_v39 = vpop.f32.mrf.mxu0  ;;  %328 = vmatmul.mubr.f32.vlgmr.msra.gmra.mxu1 %v214_v37 }
 0x125   :  { %v222_v40 = vadd.f32 %v221_v39, %v144_v32  ;;  %641 = vmatpush3.msra.mxu1 %v480_v52  ;;  %v481_v32 = vld [vmem:[#allocation10 + $0x80] sm:$0xff] }
 0x126   :  { %642 = vmatprep.subr.mxu1 %v495_v53 }
 0x127   :  { %332 = vmatprep.mubr.f32.mxu1 %v222_v40  ;;  %643 = vmatpush3.msra.mxu1 %v479_v54 }
 0x128   :  { %333 = vmatmul.mubr.f32.gmra.mxu1 %v220_v41  ;;  %644 = vmatprep.subr.mxu1 %v494_v55 }
 0x129   :  { %645 = vmatpush3.msra.mxu1 %v478_v56 }
 0x12a   :  { %646 = vmatprep.subr.mxu1 %v493_v57 }
 0x12b   :  { %647 = vmatpush3.msra.mxu1 %v477_v58 }
 0x12c   :  { %648 = vmatprep.subr.mxu1 %v492_v59 }
 0x12d   :  { %649 = vmatpush3.msra.mxu1 %v476_v60 }
 0x12e   :  { %650 = vmatprep.subr.mxu1 %v491_v61 }
 0x12f   :  { %651 = vmatpush3.msra.mxu1 %v475_v62 }
 0x130   :  { %652 = vmatprep.subr.mxu1 %v490_v63 }
 0x131   :  { %653 = vmatpush3.msra.mxu1 %v474_v1 }
 0x132   :  { %654 = vmatprep.subr.mxu1 %v489_v2 }
 0x133   :  { %655 = vmatpush3.msra.mxu1 %v473_v3 }
 0x134   :  { %656 = vmatprep.subr.mxu1 %v488_v4 }
 0x135   :  { %657 = vmatpush3.msra.mxu1 %v472_v5 }
 0x136   :  { %658 = vmatprep.subr.mxu1 %v487_v6 }
 0x137   :  { %659 = vmatpush3.msra.mxu1 %v471_v7 }
 0x138   :  { %660 = vmatprep.subr.mxu1 %v486_v8 }
 0x139   :  { %661 = vmatpush3.msra.mxu1 %v470_v9 }
 0x13a   :  { %662 = vmatprep.subr.mxu1 %v485_v10 }
 0x13b   :  { %663 = vmatpush3.msra.mxu1 %v469_v11 }
 0x13c   :  { %664 = vmatprep.subr.mxu1 %v484_v23 }
 0x13d   :  { %665 = vmatpush3.msra.mxu1 %v468_v24 }
 0x13e   :  { %666 = vmatprep.subr.mxu1 %v483_v25 }
 0x13f   :  { %667 = vmatpush3.msra.mxu1 %v467_v26 }
 0x140   :  { %668 = vmatprep.subr.mxu1 %v482_v27 }
 0x141   :  { %669 = vmatpush3.msra.mxu1 %v466_v31 }
 0x142   :  { %670 = vmatprep.subr.mxu1 %v481_v32 }
 0x143   :  { %671 = vmatpush3.msra.mxu1 %v465_v33 }
 0x1e4   :  { %v634_v12 = vpop.f32.mrf.mxu1 }
 0x1e6   :  { %v635_v14 = vpop.f32.mrf.mxu1 }
 0x1e7   :  { %v636_v15 = vadd.f32 %v635_v14, %v634_v12 }
 0x1e8   :  { %v637_v16 = vpop.f32.mrf.mxu1 }
 0x1e9   :  { %v330_v17 = vadd.f32 %v636_v15, %v600_v13 }
 0x1ea   :  { %v638_v18 = vpop.f32.mrf.mxu1 }
 0x1eb   :  { %v338_v19 = vmax.f32 %v330_v17, 0.0  ;;  %v639_v20 = vadd.f32 %v638_v18, %v637_v16 }
 0x1ed   :  { %v335_v21 = vadd.f32 %v639_v20, %v600_v13  ;;  %449 = vmatmul.mubr.f32.vlgmr.msra.gmra.mxu0 %v338_v19 }
 0x1ee   :  { %454 = vmatprep.mubr.f32.mxu0 %v826_v0  ;;  %v372_v0 = vld [vmem:[%s942_s6] sm:$0x3] }
 0x1ef   :  { %v339_v22 = vmax.f32 %v335_v21, 0.0  ;;  %v377_v34 = vrot.slane %v372_v0, %v139_v30  ;;  %v381_v35 = vrot.slane %v372_v0, %v143_v29 }
 0x1f1   :  { %455 = vmatmul.mubr.f32.gmra.mxu0 %v339_v22 }
 0x2ad   :  { %v450_v36 = vpop.f32.mrf.mxu0 }
 0x2ae   :  { %v451_v37 = vadd.f32 %v450_v36, %v377_v34 }
 0x2af   :  { %v452_v38 = vpop.f32.mrf.mxu0 }
 0x2b0   :  { %v453_v39 = vadd.f32 %v452_v38, %v381_v35  ;;  %v461_v42 = vmax.f32 %v451_v37, 0.0 }
 0x2b1   :  { %v456_v40 = vpop.f32.mrf.mxu0 }
 0x2b2   :  { %v462_v41 = vmax.f32 %v453_v39, 0.0  ;;  %v457_v43 = vadd.f32 %v456_v40, %v377_v34 }
 0x2b3   :  { %v458_v44 = vpop.f32.mrf.mxu0 }
 0x2b4   :  { %v459_v45 = vadd.f32 %v458_v44, %v381_v35  ;;  %568 = vmatprep.mubr.f32.mxu1 %v462_v41  ;;  %v463_v47 = vmax.f32 %v457_v43, 0.0 }
 0x2b5   :  { %569 = vmatmul.mubr.f32.vlgmr.msra.gmra.mxu1 %v461_v42 }
 0x2b6   :  { %v464_v46 = vmax.f32 %v459_v45, 0.0 }
 0x2b8   :  { %573 = vmatprep.mubr.f32.mxu1 %v464_v46 }
 0x2b9   :  { %574 = vmatmul.mubr.f32.gmra.mxu1 %v463_v47 }
 0x375   :  { %v672_v30 = vpop.f32.mrf.mxu1 }
 0x377   :  { %v673_v29 = vpop.f32.mrf.mxu1 }
 0x378   :  { %v674_v48 = vadd.f32 %v673_v29, %v672_v30 }
 0x379   :  { %v675_v49 = vpop.f32.mrf.mxu1 }
 0x37a   :  { %v571_v50 = vadd.f32 %v674_v48, %v601_v28 }
 0x37b   :  { %v676_v51 = vpop.f32.mrf.mxu1 }
 0x37c   :  { %579 = vst [vmem:[#allocation11] sm:$0xff] %v571_v50  ;;  %v677_v52 = vadd.f32 %v676_v51, %v675_v49 }
 0x37e   :  { %v576_v53 = vadd.f32 %v677_v52, %v601_v28 }
 0x380   :  { %580 = vst [vmem:[#allocation11 + $0x8] sm:$0xff] %v576_v53 }
 0x381   :  { %800 = shalt.err (!%p797_p1)
}
 0x382   :  { %592 = dma.vmem_to_hbm [thread:$0]  %s587_s18, 256, %s945_s9, [#allocation4], %s822_s1, %s822_s1, %s823_s24  }
 0x383   :  { %815 = dma.done.wait [#allocation4], 256  }
 0x384   :  { %816 = vsyncadd [#allocation4], 4294967040 }
 0x385   :  { %596 = vsyncpa [#allocation3], 1 }
 0x386   :  { %597 = vsyncpa [#allocation6], 1 }
 0x387   :  { %598 = vsyncpa [#allocation9], 1 }
 0x388   :  { %599 = vsyncpa [#allocation4], 1 }

</bundles_post_ra>
